<compile_context>
chip_gen: v7x
topology: tpu7x:2x2x1
jax: 0.10.0
libtpu: 0.0.40
codegen_flags: <defaults>
</compile_context>

<pallas_src>
import math
from functools import partial

import jax
import jax.numpy as jnp
from jax import lax
from jax.experimental import pallas as pl
from jax.experimental.pallas import tpu as pltpu

TILE_M_MAX = 512   # row tile for the FFN / output-projection kernels


def _round_up(x, m):
    return (x + m - 1) // m * m


def _pick_tile(m, cap):
    """Largest tile <= cap that divides m (m is a multiple of 8)."""
    if m <= cap:
        return m
    t = (cap // 8) * 8
    while m % t:
        t -= 8
    return max(t, 8)


def _default_vmem_limit():
    # ~3/4 of physical VMEM, capped at 96 MiB; conservative fallback.
    try:
        cap = getattr(pltpu.get_tpu_info(), "vmem_capacity_bytes", None)
        if not cap:
            return 32 * 1024 * 1024
        return int(min(96 * 1024 * 1024, cap * 3 // 4))
    except Exception:
        return 32 * 1024 * 1024


VMEM_LIMIT = _default_vmem_limit()


def _cparams(n_parallel):
    return pltpu.CompilerParams(
        dimension_semantics=("parallel",) * n_parallel,
        vmem_limit_bytes=VMEM_LIMIT)


# ----------------------------- kernel helpers -----------------------------

def _layernorm(y, g, b):
    # single-pass statistics: var = E[y^2] - mean^2 (independent reductions)
    n = y.shape[-1]
    mean = jnp.sum(y, axis=-1, keepdims=True) * (1.0 / n)
    msq = jnp.sum(y * y, axis=-1, keepdims=True) * (1.0 / n)
    var = msq - mean * mean
    return (y - mean) * lax.rsqrt(var + 1e-5) * g + b


def _softmax_rows(e, exact):
    m = jnp.max(e, axis=-1, keepdims=True)
    p = jnp.exp(e - m)
    s = jnp.sum(p, axis=-1, keepdims=True)
    if exact:
        return p / s
    return p * pl.reciprocal(s, approx=True)


# ----------------------------- Pallas kernels -----------------------------

def _mha_self_kernel(x_ref, mask_ref, wqkv_ref, bqkv_ref, wo_ref, bo_ref,
                     g_ref, b_ref, o_ref, cat_ref, *, n_heads, scale_inv):
    # x: [1, L, hid] bf16; mask: [1, 1 or L, L] int32 (0 = masked)
    x = x_ref[0]                                        # [L, hid] bf16
    L, hid = x.shape
    dh = hid // n_heads
    qkv = jnp.dot(x, wqkv_ref[...],
                  preferred_element_type=jnp.float32) + bqkv_ref[...]
    mask = mask_ref[0]                                  # [1 or L, L]
    for h in range(n_heads):
        q = (qkv[:, h * dh:(h + 1) * dh] * scale_inv).astype(jnp.bfloat16)
        k = qkv[:, hid + h * dh: hid + (h + 1) * dh].astype(jnp.bfloat16)
        v = qkv[:, 2 * hid + h * dh: 2 * hid + (h + 1) * dh].astype(jnp.bfloat16)
        e = lax.dot_general(q, k, (((1,), (1,)), ((), ())),
                            preferred_element_type=jnp.float32)   # [L, L]
        e = jnp.where(mask == 0, -1e10, e)
        attn = _softmax_rows(e, exact=False)
        cat_ref[:, h * dh:(h + 1) * dh] = jnp.dot(
            attn.astype(jnp.bfloat16), v, preferred_element_type=jnp.float32)
    y = jnp.dot(cat_ref[...].astype(jnp.bfloat16), wo_ref[...],
                preferred_element_type=jnp.float32) + bo_ref[...]
    y = y + x.astype(jnp.float32)
    o_ref[0] = _layernorm(y, g_ref[...], b_ref[...]).astype(o_ref.dtype)


def _cross_attn_body(x_ref, src_ref, mask_ref, wq_ref, bq_ref, wkv_ref,
                     bkv_ref, wo_ref, bo_ref, g_ref, b_ref, o_ref, cat_ref,
                     a_ref, n_heads, scale_inv, exact_softmax):
    x = x_ref[0]                                        # [Lq, hid] bf16
    src = src_ref[0]                                    # [Lk, hid] bf16
    Lq, hid = x.shape
    dh = hid // n_heads
    qa = jnp.dot(x, wq_ref[...],
                 preferred_element_type=jnp.float32) + bq_ref[...]
    kv = jnp.dot(src, wkv_ref[...],
                 preferred_element_type=jnp.float32) + bkv_ref[...]
    mask = mask_ref[0]                                  # [1, Lk]
    for h in range(n_heads):
        q = (qa[:, h * dh:(h + 1) * dh] * scale_inv).astype(jnp.bfloat16)
        k = kv[:, h * dh:(h + 1) * dh].astype(jnp.bfloat16)
        v = kv[:, hid + h * dh: hid + (h + 1) * dh].astype(jnp.bfloat16)
        e = lax.dot_general(q, k, (((1,), (1,)), ((), ())),
                            preferred_element_type=jnp.float32)   # [Lq, Lk]
        e = jnp.where(mask == 0, -1e10, e)
        attn = _softmax_rows(e, exact=exact_softmax)
        if a_ref is not None:
            a_ref[0, h] = attn
        cat_ref[:, h * dh:(h + 1) * dh] = jnp.dot(
            attn.astype(jnp.bfloat16), v, preferred_element_type=jnp.float32)
    y = jnp.dot(cat_ref[...].astype(jnp.bfloat16), wo_ref[...],
                preferred_element_type=jnp.float32) + bo_ref[...]
    y = y + x.astype(jnp.float32)
    o_ref[0] = _layernorm(y, g_ref[...], b_ref[...]).astype(o_ref.dtype)


def _mha_cross_kernel(x_ref, src_ref, mask_ref, wq_ref, bq_ref, wkv_ref,
                      bkv_ref, wo_ref, bo_ref, g_ref, b_ref, o_ref, cat_ref,
                      *, n_heads, scale_inv):
    _cross_attn_body(x_ref, src_ref, mask_ref, wq_ref, bq_ref, wkv_ref,
                     bkv_ref, wo_ref, bo_ref, g_ref, b_ref, o_ref, cat_ref,
                     None, n_heads, scale_inv, exact_softmax=False)


def _mha_cross_kernel_w(x_ref, src_ref, mask_ref, wq_ref, bq_ref, wkv_ref,
                        bkv_ref, wo_ref, bo_ref, g_ref, b_ref, o_ref, a_ref,
                        cat_ref, *, n_heads, scale_inv):
    _cross_attn_body(x_ref, src_ref, mask_ref, wq_ref, bq_ref, wkv_ref,
                     bkv_ref, wo_ref, bo_ref, g_ref, b_ref, o_ref, cat_ref,
                     a_ref, n_heads, scale_inv, exact_softmax=True)


def _ffn_res_ln_kernel(x_ref, w1_ref, b1_ref, w2_ref, b2_ref, g_ref, bb_ref,
                       o_ref):
    # LayerNorm(x + FFN(x)); FFN = relu(x W1 + b1) W2 + b2
    x = x_ref[0]                                        # [tl, hid] bf16
    h = jnp.dot(x, w1_ref[...],
                preferred_element_type=jnp.float32) + b1_ref[...]
    h = jnp.maximum(h, 0.0)
    y = jnp.dot(h.astype(jnp.bfloat16), w2_ref[...],
                preferred_element_type=jnp.float32) + b2_ref[...]
    y = y + x.astype(jnp.float32)
    o_ref[0] = _layernorm(y, g_ref[...], bb_ref[...]).astype(o_ref.dtype)


def _linear_kernel(x_ref, w_ref, b_ref, o_ref):
    o_ref[0] = jnp.dot(x_ref[0], w_ref[...],
                       preferred_element_type=jnp.float32) + b_ref[...]


# ----------------------------- Pallas wrappers -----------------------------

def pallas_mha_self(x, mask, p, p_ln, n_heads):
    # x: [B, L, hid] bf16; mask: [B, 1 or L, L] int32
    B, L, hid = x.shape
    Lm = mask.shape[1]
    scale_inv = 1.0 / math.sqrt(hid // n_heads)
    wspec = lambda shp: pl.BlockSpec(shp, lambda b: (0,) * len(shp))
    return pl.pallas_call(
        partial(_mha_self_kernel, n_heads=n_heads, scale_inv=scale_inv),
        grid=(B,),
        in_specs=[pl.BlockSpec((1, L, hid), lambda b: (b, 0, 0)),
                  pl.BlockSpec((1, Lm, L), lambda b: (b, 0, 0)),
                  wspec((hid, 3 * hid)), wspec((1, 3 * hid)),
                  wspec((hid, hid)), wspec((1, hid)),
                  wspec((1, hid)), wspec((1, hid))],
        out_specs=pl.BlockSpec((1, L, hid), lambda b: (b, 0, 0)),
        out_shape=jax.ShapeDtypeStruct((B, L, hid), jnp.bfloat16),
        scratch_shapes=[pltpu.VMEM((L, hid), jnp.float32)],
        compiler_params=_cparams(1),
    )(x, mask, p['wqkv'], p['bqkv'], p['wo'], p['bo'], p_ln['g'], p_ln['b'])


def pallas_mha_cross(x, kv_src, mask, p, p_ln, n_heads, need_weights):
    # x: [B, Lq, hid] bf16; kv_src: [B, Lk, hid] bf16; mask: [B, 1, Lk] int32
    B, Lq, hid = x.shape
    Lk = kv_src.shape[1]
    scale_inv = 1.0 / math.sqrt(hid // n_heads)
    wspec = lambda shp: pl.BlockSpec(shp, lambda b: (0,) * len(shp))
    in_specs = [pl.BlockSpec((1, Lq, hid), lambda b: (b, 0, 0)),
                pl.BlockSpec((1, Lk, hid), lambda b: (b, 0, 0)),
                pl.BlockSpec((1, 1, Lk), lambda b: (b, 0, 0)),
                wspec((hid, hid)), wspec((1, hid)),
                wspec((hid, 2 * hid)), wspec((1, 2 * hid)),
                wspec((hid, hid)), wspec((1, hid)),
                wspec((1, hid)), wspec((1, hid))]
    args = (x, kv_src, mask, p['wq'], p['bq'], p['wkv'], p['bkv'],
            p['wo'], p['bo'], p_ln['g'], p_ln['b'])
    o_spec = pl.BlockSpec((1, Lq, hid), lambda b: (b, 0, 0))
    scratch = [pltpu.VMEM((Lq, hid), jnp.float32)]
    if need_weights:
        a_spec = pl.BlockSpec((1, n_heads, Lq, Lk), lambda b: (b, 0, 0, 0))
        out, attn = pl.pallas_call(
            partial(_mha_cross_kernel_w, n_heads=n_heads, scale_inv=scale_inv),
            grid=(B,),
            in_specs=in_specs,
            out_specs=(o_spec, a_spec),
            out_shape=(jax.ShapeDtypeStruct((B, Lq, hid), jnp.bfloat16),
                       jax.ShapeDtypeStruct((B, n_heads, Lq, Lk), jnp.float32)),
            scratch_shapes=scratch,
            compiler_params=_cparams(1),
        )(*args)
        return out, attn
    out = pl.pallas_call(
        partial(_mha_cross_kernel, n_heads=n_heads, scale_inv=scale_inv),
        grid=(B,),
        in_specs=in_specs,
        out_specs=o_spec,
        out_shape=jax.ShapeDtypeStruct((B, Lq, hid), jnp.bfloat16),
        scratch_shapes=scratch,
        compiler_params=_cparams(1),
    )(*args)
    return out, None


def pallas_ffn_res_ln(x, p_ff, p_ln):
    B, L, hid = x.shape
    pf = p_ff['w1'].shape[1]
    tl = _pick_tile(L, TILE_M_MAX)
    wspec = lambda shp: pl.BlockSpec(shp, lambda b, i: (0,) * len(shp))
    return pl.pallas_call(
        _ffn_res_ln_kernel,
        grid=(B, L // tl),
        in_specs=[pl.BlockSpec((1, tl, hid), lambda b, i: (b, i, 0)),
                  wspec((hid, pf)), wspec((1, pf)),
                  wspec((pf, hid)), wspec((1, hid)),
                  wspec((1, hid)), wspec((1, hid))],
        out_specs=pl.BlockSpec((1, tl, hid), lambda b, i: (b, i, 0)),
        out_shape=jax.ShapeDtypeStruct((B, L, hid), jnp.bfloat16),
        compiler_params=_cparams(2),
    )(x, p_ff['w1'], p_ff['b1'], p_ff['w2'], p_ff['b2'],
      p_ln['g'], p_ln['b'])


def pallas_linear(x, w, b):
    # x: [B, L, hid] bf16; w: [hid, N] bf16; b: [1, N] f32 -> [B, L, N] f32
    B, L, hid = x.shape
    n = w.shape[1]
    tl = _pick_tile(L, TILE_M_MAX)
    wspec = lambda shp: pl.BlockSpec(shp, lambda bb, i: (0,) * len(shp))
    return pl.pallas_call(
        _linear_kernel,
        grid=(B, L // tl),
        in_specs=[pl.BlockSpec((1, tl, hid), lambda bb, i: (bb, i, 0)),
                  wspec((hid, n)), wspec((1, n))],
        out_specs=pl.BlockSpec((1, tl, n), lambda bb, i: (bb, i, 0)),
        out_shape=jax.ShapeDtypeStruct((B, L, n), jnp.float32),
        compiler_params=_cparams(2),
    )(x, w, b)


# ----------------------------- model (glue) -----------------------------

def embed(tok_emb, pos_emb, tokens, pad_len):
    # TODO(synk): token/position embedding gather stays as an XLA take (no
    # simple Pallas gather); it runs once per forward pass.
    B, L = tokens.shape
    hid = tok_emb.shape[1]
    x = tok_emb[tokens] * math.sqrt(hid) + pos_emb[:L][None, :, :]
    x = x.astype(jnp.bfloat16)
    if pad_len != L:
        x = jnp.pad(x, ((0, 0), (0, pad_len - L), (0, 0)))
    return x


def make_src_mask(src, src_pad_idx, pad_len):
    # compact [B, 1, Lk]; broadcast across heads / query rows inside kernel
    m = (src != src_pad_idx).astype(jnp.int32)[:, None, :]
    L = src.shape[1]
    if pad_len != L:
        m = jnp.pad(m, ((0, 0), (0, 0), (0, pad_len - L)))   # padded keys masked
    return m


def make_trg_mask(trg, trg_pad_idx, pad_len):
    B, L = trg.shape
    pad = (trg != trg_pad_idx)[:, None, :]                    # [B,1,L]
    sub = jnp.tril(jnp.ones((L, L), dtype=bool))
    m = (pad & sub[None]).astype(jnp.int32)                   # [B,L,L]
    if pad_len != L:
        m = jnp.pad(m, ((0, 0), (0, pad_len - L), (0, pad_len - L)))
    return m


def encoder_fwd(p, src, src_mask, n_heads, pad_len):
    x = embed(p['tok_emb'], p['pos_emb'], src, pad_len)
    for lp in p['layers']:
        x = pallas_mha_self(x, src_mask, lp['sa'], lp['sa_ln'], n_heads)
        x = pallas_ffn_res_ln(x, lp['ff'], lp['ff_ln'])
    return x


def decoder_fwd(p, trg, enc_src, trg_mask, src_mask, n_heads, pad_len):
    x = embed(p['tok_emb'], p['pos_emb'], trg, pad_len)
    attention = None
    n_layers = len(p['layers'])
    for i, lp in enumerate(p['layers']):
        x = pallas_mha_self(x, trg_mask, lp['sa'], lp['sa_ln'], n_heads)
        # only the last layer's cross-attention weights are consumed
        x, attn = pallas_mha_cross(x, enc_src, src_mask, lp['ea'], lp['ea_ln'],
                                   n_heads, need_weights=(i == n_layers - 1))
        if attn is not None:
            attention = attn
        x = pallas_ffn_res_ln(x, lp['ff'], lp['ff_ln'])
    logits = pallas_linear(x, p['fc_out']['w'], p['fc_out']['b'])
    return logits, attention


def seq2seq_forward(params, src, trg, src_pad_idx, trg_pad_idx, n_heads):
    B, Ls = src.shape
    _, Lt = trg.shape
    Lsp = _round_up(Ls, 8)
    Ltp = _round_up(Lt, 8)
    src_mask = make_src_mask(src, src_pad_idx, Lsp)
    trg_mask = make_trg_mask(trg, trg_pad_idx, Ltp)
    enc_src = encoder_fwd(params['encoder'], src, src_mask, n_heads, Lsp)
    logits, attention = decoder_fwd(params['decoder'], trg, enc_src,
                                    trg_mask, src_mask, n_heads, Ltp)
    return logits[:, :Lt], attention[:, :, :Lt, :Ls]


# ----------------------------- param init -----------------------------
# Linear weights stored pre-transposed [in, out], bf16, with Q|K|V (and K|V)
# fused along the output dim; biases / LN params / embeddings stay f32.

def _randn(key, shape):
    return jax.random.normal(key, shape, jnp.float32) * 0.02


def _init_ln(hid):
    return {'g': jnp.ones((1, hid), jnp.float32),
            'b': jnp.zeros((1, hid), jnp.float32)}


def _init_mha(key, hid, fuse_qkv):
    ks = jax.random.split(key, 8)
    wq, bq = _randn(ks[0], (hid, hid)), _randn(ks[1], (1, hid))
    wk, bk = _randn(ks[2], (hid, hid)), _randn(ks[3], (1, hid))
    wv, bv = _randn(ks[4], (hid, hid)), _randn(ks[5], (1, hid))
    wo, bo = _randn(ks[6], (hid, hid)), _randn(ks[7], (1, hid))
    p = {'wo': wo.astype(jnp.bfloat16), 'bo': bo}
    if fuse_qkv:
        p['wqkv'] = jnp.concatenate([wq, wk, wv], axis=1).astype(jnp.bfloat16)
        p['bqkv'] = jnp.concatenate([bq, bk, bv], axis=1)
    else:
        p['wq'] = wq.astype(jnp.bfloat16)
        p['bq'] = bq
        p['wkv'] = jnp.concatenate([wk, wv], axis=1).astype(jnp.bfloat16)
        p['bkv'] = jnp.concatenate([bk, bv], axis=1)
    return p


def _init_ffn(key, hid, pf):
    ks = jax.random.split(key, 4)
    return {'w1': _randn(ks[0], (hid, pf)).astype(jnp.bfloat16),
            'b1': _randn(ks[1], (1, pf)),
            'w2': _randn(ks[2], (pf, hid)).astype(jnp.bfloat16),
            'b2': _randn(ks[3], (1, hid))}


def _init_enc_layer(key, hid, pf):
    ks = jax.random.split(key, 2)
    return {'sa': _init_mha(ks[0], hid, True), 'sa_ln': _init_ln(hid),
            'ff': _init_ffn(ks[1], hid, pf), 'ff_ln': _init_ln(hid)}


def _init_dec_layer(key, hid, pf):
    ks = jax.random.split(key, 3)
    return {'sa': _init_mha(ks[0], hid, True), 'sa_ln': _init_ln(hid),
            'ea': _init_mha(ks[1], hid, False), 'ea_ln': _init_ln(hid),
            'ff': _init_ffn(ks[2], hid, pf), 'ff_ln': _init_ln(hid)}


def init_params(key, input_dim, output_dim, hid, pf, n_layers, max_len):
    k_enc, k_dec = jax.random.split(key)
    ek = jax.random.split(k_enc, n_layers + 2)
    dk = jax.random.split(k_dec, n_layers + 4)
    encoder = {
        'tok_emb': _randn(ek[0], (input_dim, hid)),
        'pos_emb': _randn(ek[1], (max_len, hid)),
        'layers': [_init_enc_layer(ek[2 + i], hid, pf) for i in range(n_layers)],
    }
    decoder = {
        'tok_emb': _randn(dk[0], (output_dim, hid)),
        'pos_emb': _randn(dk[1], (max_len, hid)),
        'layers': [_init_dec_layer(dk[2 + i], hid, pf) for i in range(n_layers)],
        'fc_out': {'w': _randn(dk[2 + n_layers], (hid, output_dim)).astype(jnp.bfloat16),
                   'b': _randn(dk[3 + n_layers], (1, output_dim))},
    }
    return {'encoder': encoder, 'decoder': decoder}


# ----------------------------- main -----------------------------

if __name__ == "__main__":
    # small deterministic config
    INPUT_DIM, OUTPUT_DIM = 16, 16
    HID_DIM, N_HEADS, PF_DIM, N_LAYERS = 32, 4, 64, 2
    MAX_LEN = 32
    SRC_PAD_IDX, TRG_PAD_IDX = 0, 0
    B, SRC_LEN, TRG_LEN = 2, 8, 6

    key = jax.random.PRNGKey(0)
    k_params, k_src, k_trg = jax.random.split(key, 3)

    params = init_params(k_params, INPUT_DIM, OUTPUT_DIM, HID_DIM, PF_DIM,
                         N_LAYERS, MAX_LEN)

    src = jax.random.randint(k_src, (B, SRC_LEN), 0, INPUT_DIM, dtype=jnp.int32)
    trg = jax.random.randint(k_trg, (B, TRG_LEN), 0, OUTPUT_DIM, dtype=jnp.int32)
    # guarantee some padding positions so the masks are exercised
    src = src.at[:, -1].set(SRC_PAD_IDX)
    trg = trg.at[:, -1].set(TRG_PAD_IDX)

    output, attention = seq2seq_forward(params, src, trg,
                                        SRC_PAD_IDX, TRG_PAD_IDX, N_HEADS)
    output = jax.block_until_ready(output)
    attention = jax.block_until_ready(attention)

    assert output.shape == (B, TRG_LEN, OUTPUT_DIM)
    assert attention.shape == (B, N_HEADS, TRG_LEN, SRC_LEN)
    assert bool(jnp.all(jnp.isfinite(output)))
    assert bool(jnp.all(jnp.isfinite(attention)))

    print("KERNEL_OK")
</pallas_src>

<mosaic_0001>
module attributes {stable_mosaic.version = 11 : i64} {
  func.func @_mha_self_kernel(%arg0: i32, %arg1: memref<1x8x32xbf16, #tpu.memory_space<vmem>>, %arg2: memref<1x1x8xi32, #tpu.memory_space<vmem>>, %arg3: memref<32x96xbf16, #tpu.memory_space<vmem>>, %arg4: memref<1x96xf32, #tpu.memory_space<vmem>>, %arg5: memref<32x32xbf16, #tpu.memory_space<vmem>>, %arg6: memref<1x32xf32, #tpu.memory_space<vmem>>, %arg7: memref<1x32xf32, #tpu.memory_space<vmem>>, %arg8: memref<1x32xf32, #tpu.memory_space<vmem>>, %arg9: memref<1x8x32xbf16, #tpu.memory_space<vmem>>, %arg10: memref<8x32xf32, #tpu.memory_space<vmem>>) attributes {dimension_semantics = [#tpu.dimension_semantics<parallel>], iteration_bounds = array<i64: 2>, scalar_prefetch = 0 : i64, scratch_operands = 1 : i64, tpu.core_type = #tpu.core_type<tc>, window_params = [{transform_indices = @transform_0, window_bounds = array<i64: 1, 8, 32>}, {transform_indices = @transform_1, window_bounds = array<i64: 1, 1, 8>}, {pipeline_mode = #tpu.pipeline_mode<synchronous>, transform_indices = @transform_2, window_bounds = array<i64: 32, 96>}, {pipeline_mode = #tpu.pipeline_mode<synchronous>, transform_indices = @transform_3, window_bounds = array<i64: 1, 96>}, {pipeline_mode = #tpu.pipeline_mode<synchronous>, transform_indices = @transform_4, window_bounds = array<i64: 32, 32>}, {pipeline_mode = #tpu.pipeline_mode<synchronous>, transform_indices = @transform_5, window_bounds = array<i64: 1, 32>}, {pipeline_mode = #tpu.pipeline_mode<synchronous>, transform_indices = @transform_6, window_bounds = array<i64: 1, 32>}, {pipeline_mode = #tpu.pipeline_mode<synchronous>, transform_indices = @transform_7, window_bounds = array<i64: 1, 32>}, {transform_indices = @transform_8, window_bounds = array<i64: 1, 8, 32>}]} {
    %c0 = arith.constant 0 : index
    %c0_0 = arith.constant 0 : index
    %c0_1 = arith.constant 0 : index
    %0 = vector.load %arg1[%c0, %c0_0, %c0_1] : memref<1x8x32xbf16, #tpu.memory_space<vmem>>, vector<1x8x32xbf16>
    %1 = vector.shape_cast %0 : vector<1x8x32xbf16> to vector<8x32xbf16>
    %c0_2 = arith.constant 0 : index
    %c0_3 = arith.constant 0 : index
    %2 = vector.load %arg3[%c0_2, %c0_3] : memref<32x96xbf16, #tpu.memory_space<vmem>>, vector<32x96xbf16>
    %cst = arith.constant dense<0.000000e+00> : vector<8x96xf32>
    %3 = tpu.matmul %1, %2, %cst {dimension_numbers = #tpu.dot_dimension_numbers<[1], [0], [0], [1], [0, 0, 1, 1], [], []>} : vector<8x32xbf16>, vector<32x96xbf16>, vector<8x96xf32> -> vector<8x96xf32>
    %c0_4 = arith.constant 0 : index
    %c0_5 = arith.constant 0 : index
    %4 = vector.load %arg4[%c0_4, %c0_5] : memref<1x96xf32, #tpu.memory_space<vmem>>, vector<1x96xf32>
    %5 = vector.broadcast %4 : vector<1x96xf32> to vector<8x96xf32>
    %6 = arith.addf %3, %5 : vector<8x96xf32>
    %c0_6 = arith.constant 0 : index
    %c0_7 = arith.constant 0 : index
    %c0_8 = arith.constant 0 : index
    %7 = vector.load %arg2[%c0_6, %c0_7, %c0_8] : memref<1x1x8xi32, #tpu.memory_space<vmem>>, vector<1x1x8xi32>
    %8 = vector.shape_cast %7 : vector<1x1x8xi32> to vector<1x8xi32>
    %9 = vector.extract_strided_slice %6 {offsets = [0, 0], sizes = [8, 8], strides = [1, 1]} : vector<8x96xf32> to vector<8x8xf32>
    %cst_9 = arith.constant 0.353553385 : f32
    %10 = vector.broadcast %cst_9 : f32 to vector<8x8xf32>
    %11 = arith.mulf %9, %10 : vector<8x8xf32>
    %12 = arith.truncf %11 : vector<8x8xf32> to vector<8x8xbf16>
    %13 = vector.extract_strided_slice %6 {offsets = [0, 32], sizes = [8, 8], strides = [1, 1]} : vector<8x96xf32> to vector<8x8xf32>
    %14 = arith.truncf %13 : vector<8x8xf32> to vector<8x8xbf16>
    %15 = vector.extract_strided_slice %6 {offsets = [0, 64], sizes = [8, 8], strides = [1, 1]} : vector<8x96xf32> to vector<8x8xf32>
    %16 = arith.truncf %15 : vector<8x8xf32> to vector<8x8xbf16>
    %cst_10 = arith.constant dense<0.000000e+00> : vector<8x8xf32>
    %17 = tpu.matmul %12, %14, %cst_10 {dimension_numbers = #tpu.dot_dimension_numbers<[1], [1], [0], [0], [0, 0, 1, 0], [], []>} : vector<8x8xbf16>, vector<8x8xbf16>, vector<8x8xf32> -> vector<8x8xf32>
    %c0_i32 = arith.constant 0 : i32
    %18 = vector.broadcast %c0_i32 : i32 to vector<1x8xi32>
    %19 = arith.cmpi eq, %8, %18 : vector<1x8xi32>
    %cst_11 = arith.constant -1.000000e+10 : f32
    %20 = vector.shape_cast %19 : vector<1x8xi1> to vector<1x8xi1>
    %21 = vector.broadcast %20 : vector<1x8xi1> to vector<8x8xi1>
    %22 = vector.broadcast %cst_11 : f32 to vector<8x8xf32>
    %23 = arith.select %21, %22, %17 : vector<8x8xi1>, vector<8x8xf32>
    %cst_12 = arith.constant dense<0xFF800000> : vector<8xf32>
    %24 = vector.multi_reduction <maximumf>, %23, %cst_12 [1] : vector<8x8xf32> to vector<8xf32>
    %25 = vector.shape_cast %24 : vector<8xf32> to vector<8x1xf32>
    %26 = vector.broadcast %25 : vector<8x1xf32> to vector<8x8xf32>
    %27 = arith.subf %23, %26 : vector<8x8xf32>
    %28 = math.exp %27 : vector<8x8xf32>
    %cst_13 = arith.constant dense<0.000000e+00> : vector<8xf32>
    %29 = vector.multi_reduction <add>, %28, %cst_13 [1] : vector<8x8xf32> to vector<8xf32>
    %30 = vector.shape_cast %29 : vector<8xf32> to vector<8x1xf32>
    %31 = tpu.reciprocal %30 {approx = true} : vector<8x1xf32> -> vector<8x1xf32>
    %32 = vector.broadcast %31 : vector<8x1xf32> to vector<8x8xf32>
    %33 = arith.mulf %28, %32 : vector<8x8xf32>
    %34 = arith.truncf %33 : vector<8x8xf32> to vector<8x8xbf16>
    %cst_14 = arith.constant dense<0.000000e+00> : vector<8x8xf32>
    %35 = tpu.matmul %34, %16, %cst_14 {dimension_numbers = #tpu.dot_dimension_numbers<[1], [0], [0], [1], [0, 0, 1, 1], [], []>} : vector<8x8xbf16>, vector<8x8xbf16>, vector<8x8xf32> -> vector<8x8xf32>
    %c0_15 = arith.constant 0 : index
    %c0_16 = arith.constant 0 : index
    %36 = vector.load %arg10[%c0_15, %c0_16] : memref<8x32xf32, #tpu.memory_space<vmem>>, vector<8x8xf32>
    tpu.vector_store %arg10[%c0_15, %c0_16], %35 {strides = array<i32>} : memref<8x32xf32, #tpu.memory_space<vmem>>, vector<8x8xf32>,
    %37 = vector.extract_strided_slice %6 {offsets = [0, 8], sizes = [8, 8], strides = [1, 1]} : vector<8x96xf32> to vector<8x8xf32>
    %cst_17 = arith.constant 0.353553385 : f32
    %38 = vector.broadcast %cst_17 : f32 to vector<8x8xf32>
    %39 = arith.mulf %37, %38 : vector<8x8xf32>
    %40 = arith.truncf %39 : vector<8x8xf32> to vector<8x8xbf16>
    %41 = vector.extract_strided_slice %6 {offsets = [0, 40], sizes = [8, 8], strides = [1, 1]} : vector<8x96xf32> to vector<8x8xf32>
    %42 = arith.truncf %41 : vector<8x8xf32> to vector<8x8xbf16>
    %43 = vector.extract_strided_slice %6 {offsets = [0, 72], sizes = [8, 8], strides = [1, 1]} : vector<8x96xf32> to vector<8x8xf32>
    %44 = arith.truncf %43 : vector<8x8xf32> to vector<8x8xbf16>
    %cst_18 = arith.constant dense<0.000000e+00> : vector<8x8xf32>
    %45 = tpu.matmul %40, %42, %cst_18 {dimension_numbers = #tpu.dot_dimension_numbers<[1], [1], [0], [0], [0, 0, 1, 0], [], []>} : vector<8x8xbf16>, vector<8x8xbf16>, vector<8x8xf32> -> vector<8x8xf32>
    %c0_i32_19 = arith.constant 0 : i32
    %46 = vector.broadcast %c0_i32_19 : i32 to vector<1x8xi32>
    %47 = arith.cmpi eq, %8, %46 : vector<1x8xi32>
    %cst_20 = arith.constant -1.000000e+10 : f32
    %48 = vector.shape_cast %47 : vector<1x8xi1> to vector<1x8xi1>
    %49 = vector.broadcast %48 : vector<1x8xi1> to vector<8x8xi1>
    %50 = vector.broadcast %cst_20 : f32 to vector<8x8xf32>
    %51 = arith.select %49, %50, %45 : vector<8x8xi1>, vector<8x8xf32>
    %cst_21 = arith.constant dense<0xFF800000> : vector<8xf32>
    %52 = vector.multi_reduction <maximumf>, %51, %cst_21 [1] : vector<8x8xf32> to vector<8xf32>
    %53 = vector.shape_cast %52 : vector<8xf32> to vector<8x1xf32>
    %54 = vector.broadcast %53 : vector<8x1xf32> to vector<8x8xf32>
    %55 = arith.subf %51, %54 : vector<8x8xf32>
    %56 = math.exp %55 : vector<8x8xf32>
    %cst_22 = arith.constant dense<0.000000e+00> : vector<8xf32>
    %57 = vector.multi_reduction <add>, %56, %cst_22 [1] : vector<8x8xf32> to vector<8xf32>
    %58 = vector.shape_cast %57 : vector<8xf32> to vector<8x1xf32>
    %59 = tpu.reciprocal %58 {approx = true} : vector<8x1xf32> -> vector<8x1xf32>
    %60 = vector.broadcast %59 : vector<8x1xf32> to vector<8x8xf32>
    %61 = arith.mulf %56, %60 : vector<8x8xf32>
    %62 = arith.truncf %61 : vector<8x8xf32> to vector<8x8xbf16>
    %cst_23 = arith.constant dense<0.000000e+00> : vector<8x8xf32>
    %63 = tpu.matmul %62, %44, %cst_23 {dimension_numbers = #tpu.dot_dimension_numbers<[1], [0], [0], [1], [0, 0, 1, 1], [], []>} : vector<8x8xbf16>, vector<8x8xbf16>, vector<8x8xf32> -> vector<8x8xf32>
    %c0_24 = arith.constant 0 : index
    %c8 = arith.constant 8 : index
    %64 = vector.load %arg10[%c0_24, %c8] : memref<8x32xf32, #tpu.memory_space<vmem>>, vector<8x8xf32>
    tpu.vector_store %arg10[%c0_24, %c8], %63 {strides = array<i32>} : memref<8x32xf32, #tpu.memory_space<vmem>>, vector<8x8xf32>,
    %65 = vector.extract_strided_slice %6 {offsets = [0, 16], sizes = [8, 8], strides = [1, 1]} : vector<8x96xf32> to vector<8x8xf32>
    %cst_25 = arith.constant 0.353553385 : f32
    %66 = vector.broadcast %cst_25 : f32 to vector<8x8xf32>
    %67 = arith.mulf %65, %66 : vector<8x8xf32>
    %68 = arith.truncf %67 : vector<8x8xf32> to vector<8x8xbf16>
    %69 = vector.extract_strided_slice %6 {offsets = [0, 48], sizes = [8, 8], strides = [1, 1]} : vector<8x96xf32> to vector<8x8xf32>
    %70 = arith.truncf %69 : vector<8x8xf32> to vector<8x8xbf16>
    %71 = vector.extract_strided_slice %6 {offsets = [0, 80], sizes = [8, 8], strides = [1, 1]} : vector<8x96xf32> to vector<8x8xf32>
    %72 = arith.truncf %71 : vector<8x8xf32> to vector<8x8xbf16>
    %cst_26 = arith.constant dense<0.000000e+00> : vector<8x8xf32>
    %73 = tpu.matmul %68, %70, %cst_26 {dimension_numbers = #tpu.dot_dimension_numbers<[1], [1], [0], [0], [0, 0, 1, 0], [], []>} : vector<8x8xbf16>, vector<8x8xbf16>, vector<8x8xf32> -> vector<8x8xf32>
    %c0_i32_27 = arith.constant 0 : i32
    %74 = vector.broadcast %c0_i32_27 : i32 to vector<1x8xi32>
    %75 = arith.cmpi eq, %8, %74 : vector<1x8xi32>
    %cst_28 = arith.constant -1.000000e+10 : f32
    %76 = vector.shape_cast %75 : vector<1x8xi1> to vector<1x8xi1>
    %77 = vector.broadcast %76 : vector<1x8xi1> to vector<8x8xi1>
    %78 = vector.broadcast %cst_28 : f32 to vector<8x8xf32>
    %79 = arith.select %77, %78, %73 : vector<8x8xi1>, vector<8x8xf32>
    %cst_29 = arith.constant dense<0xFF800000> : vector<8xf32>
    %80 = vector.multi_reduction <maximumf>, %79, %cst_29 [1] : vector<8x8xf32> to vector<8xf32>
    %81 = vector.shape_cast %80 : vector<8xf32> to vector<8x1xf32>
    %82 = vector.broadcast %81 : vector<8x1xf32> to vector<8x8xf32>
    %83 = arith.subf %79, %82 : vector<8x8xf32>
    %84 = math.exp %83 : vector<8x8xf32>
    %cst_30 = arith.constant dense<0.000000e+00> : vector<8xf32>
    %85 = vector.multi_reduction <add>, %84, %cst_30 [1] : vector<8x8xf32> to vector<8xf32>
    %86 = vector.shape_cast %85 : vector<8xf32> to vector<8x1xf32>
    %87 = tpu.reciprocal %86 {approx = true} : vector<8x1xf32> -> vector<8x1xf32>
    %88 = vector.broadcast %87 : vector<8x1xf32> to vector<8x8xf32>
    %89 = arith.mulf %84, %88 : vector<8x8xf32>
    %90 = arith.truncf %89 : vector<8x8xf32> to vector<8x8xbf16>
    %cst_31 = arith.constant dense<0.000000e+00> : vector<8x8xf32>
    %91 = tpu.matmul %90, %72, %cst_31 {dimension_numbers = #tpu.dot_dimension_numbers<[1], [0], [0], [1], [0, 0, 1, 1], [], []>} : vector<8x8xbf16>, vector<8x8xbf16>, vector<8x8xf32> -> vector<8x8xf32>
    %c0_32 = arith.constant 0 : index
    %c16 = arith.constant 16 : index
    %92 = vector.load %arg10[%c0_32, %c16] : memref<8x32xf32, #tpu.memory_space<vmem>>, vector<8x8xf32>
    tpu.vector_store %arg10[%c0_32, %c16], %91 {strides = array<i32>} : memref<8x32xf32, #tpu.memory_space<vmem>>, vector<8x8xf32>,
    %93 = vector.extract_strided_slice %6 {offsets = [0, 24], sizes = [8, 8], strides = [1, 1]} : vector<8x96xf32> to vector<8x8xf32>
    %cst_33 = arith.constant 0.353553385 : f32
    %94 = vector.broadcast %cst_33 : f32 to vector<8x8xf32>
    %95 = arith.mulf %93, %94 : vector<8x8xf32>
    %96 = arith.truncf %95 : vector<8x8xf32> to vector<8x8xbf16>
    %97 = vector.extract_strided_slice %6 {offsets = [0, 56], sizes = [8, 8], strides = [1, 1]} : vector<8x96xf32> to vector<8x8xf32>
    %98 = arith.truncf %97 : vector<8x8xf32> to vector<8x8xbf16>
    %99 = vector.extract_strided_slice %6 {offsets = [0, 88], sizes = [8, 8], strides = [1, 1]} : vector<8x96xf32> to vector<8x8xf32>
    %100 = arith.truncf %99 : vector<8x8xf32> to vector<8x8xbf16>
    %cst_34 = arith.constant dense<0.000000e+00> : vector<8x8xf32>
    %101 = tpu.matmul %96, %98, %cst_34 {dimension_numbers = #tpu.dot_dimension_numbers<[1], [1], [0], [0], [0, 0, 1, 0], [], []>} : vector<8x8xbf16>, vector<8x8xbf16>, vector<8x8xf32> -> vector<8x8xf32>
    %c0_i32_35 = arith.constant 0 : i32
    %102 = vector.broadcast %c0_i32_35 : i32 to vector<1x8xi32>
    %103 = arith.cmpi eq, %8, %102 : vector<1x8xi32>
    %cst_36 = arith.constant -1.000000e+10 : f32
    %104 = vector.shape_cast %103 : vector<1x8xi1> to vector<1x8xi1>
    %105 = vector.broadcast %104 : vector<1x8xi1> to vector<8x8xi1>
    %106 = vector.broadcast %cst_36 : f32 to vector<8x8xf32>
    %107 = arith.select %105, %106, %101 : vector<8x8xi1>, vector<8x8xf32>
    %cst_37 = arith.constant dense<0xFF800000> : vector<8xf32>
    %108 = vector.multi_reduction <maximumf>, %107, %cst_37 [1] : vector<8x8xf32> to vector<8xf32>
    %109 = vector.shape_cast %108 : vector<8xf32> to vector<8x1xf32>
    %110 = vector.broadcast %109 : vector<8x1xf32> to vector<8x8xf32>
    %111 = arith.subf %107, %110 : vector<8x8xf32>
    %112 = math.exp %111 : vector<8x8xf32>
    %cst_38 = arith.constant dense<0.000000e+00> : vector<8xf32>
    %113 = vector.multi_reduction <add>, %112, %cst_38 [1] : vector<8x8xf32> to vector<8xf32>
    %114 = vector.shape_cast %113 : vector<8xf32> to vector<8x1xf32>
    %115 = tpu.reciprocal %114 {approx = true} : vector<8x1xf32> -> vector<8x1xf32>
    %116 = vector.broadcast %115 : vector<8x1xf32> to vector<8x8xf32>
    %117 = arith.mulf %112, %116 : vector<8x8xf32>
    %118 = arith.truncf %117 : vector<8x8xf32> to vector<8x8xbf16>
    %cst_39 = arith.constant dense<0.000000e+00> : vector<8x8xf32>
    %119 = tpu.matmul %118, %100, %cst_39 {dimension_numbers = #tpu.dot_dimension_numbers<[1], [0], [0], [1], [0, 0, 1, 1], [], []>} : vector<8x8xbf16>, vector<8x8xbf16>, vector<8x8xf32> -> vector<8x8xf32>
    %c0_40 = arith.constant 0 : index
    %c24 = arith.constant 24 : index
    %120 = vector.load %arg10[%c0_40, %c24] : memref<8x32xf32, #tpu.memory_space<vmem>>, vector<8x8xf32>
    tpu.vector_store %arg10[%c0_40, %c24], %119 {strides = array<i32>} : memref<8x32xf32, #tpu.memory_space<vmem>>, vector<8x8xf32>,
    %c0_41 = arith.constant 0 : index
    %c0_42 = arith.constant 0 : index
    %121 = vector.load %arg10[%c0_41, %c0_42] : memref<8x32xf32, #tpu.memory_space<vmem>>, vector<8x32xf32>
    %122 = arith.truncf %121 : vector<8x32xf32> to vector<8x32xbf16>
    %c0_43 = arith.constant 0 : index
    %c0_44 = arith.constant 0 : index
    %123 = vector.load %arg5[%c0_43, %c0_44] : memref<32x32xbf16, #tpu.memory_space<vmem>>, vector<32x32xbf16>
    %cst_45 = arith.constant dense<0.000000e+00> : vector<8x32xf32>
    %124 = tpu.matmul %122, %123, %cst_45 {dimension_numbers = #tpu.dot_dimension_numbers<[1], [0], [0], [1], [0, 0, 1, 1], [], []>} : vector<8x32xbf16>, vector<32x32xbf16>, vector<8x32xf32> -> vector<8x32xf32>
    %c0_46 = arith.constant 0 : index
    %c0_47 = arith.constant 0 : index
    %125 = vector.load %arg6[%c0_46, %c0_47] : memref<1x32xf32, #tpu.memory_space<vmem>>, vector<1x32xf32>
    %126 = vector.broadcast %125 : vector<1x32xf32> to vector<8x32xf32>
    %127 = arith.addf %124, %126 : vector<8x32xf32>
    %128 = arith.extf %1 : vector<8x32xbf16> to vector<8x32xf32>
    %129 = arith.addf %127, %128 : vector<8x32xf32>
    %c0_48 = arith.constant 0 : index
    %c0_49 = arith.constant 0 : index
    %130 = vector.load %arg7[%c0_48, %c0_49] : memref<1x32xf32, #tpu.memory_space<vmem>>, vector<1x32xf32>
    %c0_50 = arith.constant 0 : index
    %c0_51 = arith.constant 0 : index
    %131 = vector.load %arg8[%c0_50, %c0_51] : memref<1x32xf32, #tpu.memory_space<vmem>>, vector<1x32xf32>
    %cst_52 = arith.constant dense<0.000000e+00> : vector<8xf32>
    %132 = vector.multi_reduction <add>, %129, %cst_52 [1] : vector<8x32xf32> to vector<8xf32>
    %133 = vector.shape_cast %132 : vector<8xf32> to vector<8x1xf32>
    %cst_53 = arith.constant 3.125000e-02 : f32
    %134 = vector.broadcast %cst_53 : f32 to vector<8x1xf32>
    %135 = arith.mulf %133, %134 : vector<8x1xf32>
    %136 = arith.mulf %129, %129 : vector<8x32xf32>
    %cst_54 = arith.constant dense<0.000000e+00> : vector<8xf32>
    %137 = vector.multi_reduction <add>, %136, %cst_54 [1] : vector<8x32xf32> to vector<8xf32>
    %138 = vector.shape_cast %137 : vector<8xf32> to vector<8x1xf32>
    %cst_55 = arith.constant 3.125000e-02 : f32
    %139 = vector.broadcast %cst_55 : f32 to vector<8x1xf32>
    %140 = arith.mulf %138, %139 : vector<8x1xf32>
    %141 = arith.mulf %135, %135 : vector<8x1xf32>
    %142 = arith.subf %140, %141 : vector<8x1xf32>
    %143 = vector.broadcast %135 : vector<8x1xf32> to vector<8x32xf32>
    %144 = arith.subf %129, %143 : vector<8x32xf32>
    %cst_56 = arith.constant 9.99999974E-6 : f32
    %145 = vector.broadcast %cst_56 : f32 to vector<8x1xf32>
    %146 = arith.addf %142, %145 : vector<8x1xf32>
    %147 = math.rsqrt %146 : vector<8x1xf32>
    %148 = vector.broadcast %147 : vector<8x1xf32> to vector<8x32xf32>
    %149 = arith.mulf %144, %148 : vector<8x32xf32>
    %150 = vector.broadcast %130 : vector<1x32xf32> to vector<8x32xf32>
    %151 = arith.mulf %149, %150 : vector<8x32xf32>
    %152 = vector.broadcast %131 : vector<1x32xf32> to vector<8x32xf32>
    %153 = arith.addf %151, %152 : vector<8x32xf32>
    %154 = arith.truncf %153 : vector<8x32xf32> to vector<8x32xbf16>
    %c0_57 = arith.constant 0 : index
    %c0_58 = arith.constant 0 : index
    %c0_59 = arith.constant 0 : index
    %155 = vector.load %arg9[%c0_57, %c0_58, %c0_59] : memref<1x8x32xbf16, #tpu.memory_space<vmem>>, vector<1x8x32xbf16>
    %156 = vector.shape_cast %155 : vector<1x8x32xbf16> to vector<8x32xbf16>
    %157 = vector.shape_cast %154 : vector<8x32xbf16> to vector<1x8x32xbf16>
    tpu.vector_store %arg9[%c0_57, %c0_58, %c0_59], %157 {strides = array<i32>} : memref<1x8x32xbf16, #tpu.memory_space<vmem>>, vector<1x8x32xbf16>,
    return
  }
  func.func @transform_0(%arg0: i32) -> (i32, i32, i32) {
    %c0_i32 = arith.constant 0 : i32
    %c0_i32_0 = arith.constant 0 : i32
    %c0_i32_1 = arith.constant 0 : i32
    return %arg0, %c0_i32, %c0_i32_0 : i32, i32, i32
  }
  func.func @transform_1(%arg0: i32) -> (i32, i32, i32) {
    %c0_i32 = arith.constant 0 : i32
    %c0_i32_0 = arith.constant 0 : i32
    %c0_i32_1 = arith.constant 0 : i32
    return %arg0, %c0_i32, %c0_i32_0 : i32, i32, i32
  }
  func.func @transform_2(%arg0: i32) -> (i32, i32) {
    %c0_i32 = arith.constant 0 : i32
    %c0_i32_0 = arith.constant 0 : i32
    %c0_i32_1 = arith.constant 0 : i32
    return %c0_i32, %c0_i32_0 : i32, i32
  }
  func.func @transform_3(%arg0: i32) -> (i32, i32) {
    %c0_i32 = arith.constant 0 : i32
    %c0_i32_0 = arith.constant 0 : i32
    %c0_i32_1 = arith.constant 0 : i32
    return %c0_i32, %c0_i32_0 : i32, i32
  }
  func.func @transform_4(%arg0: i32) -> (i32, i32) {
    %c0_i32 = arith.constant 0 : i32
    %c0_i32_0 = arith.constant 0 : i32
    %c0_i32_1 = arith.constant 0 : i32
    return %c0_i32, %c0_i32_0 : i32, i32
  }
  func.func @transform_5(%arg0: i32) -> (i32, i32) {
    %c0_i32 = arith.constant 0 : i32
    %c0_i32_0 = arith.constant 0 : i32
    %c0_i32_1 = arith.constant 0 : i32
    return %c0_i32, %c0_i32_0 : i32, i32
  }
  func.func @transform_6(%arg0: i32) -> (i32, i32) {
    %c0_i32 = arith.constant 0 : i32
    %c0_i32_0 = arith.constant 0 : i32
    %c0_i32_1 = arith.constant 0 : i32
    return %c0_i32, %c0_i32_0 : i32, i32
  }
  func.func @transform_7(%arg0: i32) -> (i32, i32) {
    %c0_i32 = arith.constant 0 : i32
    %c0_i32_0 = arith.constant 0 : i32
    %c0_i32_1 = arith.constant 0 : i32
    return %c0_i32, %c0_i32_0 : i32, i32
  }
  func.func @transform_8(%arg0: i32) -> (i32, i32, i32) {
    %c0_i32 = arith.constant 0 : i32
    %c0_i32_0 = arith.constant 0 : i32
    %c0_i32_1 = arith.constant 0 : i32
    return %arg0, %c0_i32, %c0_i32_0 : i32, i32, i32
  }
}

</mosaic_0001>

<bundles_post_ra>
// kernel: tpu_custom_call.1
= control target key start
LH: loop header
LB: loop body
LE: loop exit
PB: predicated region body
PF: predicated region fallthrough
CT: control target
= control target key end

     0   :  { %13 = vsyncpa [#allocation4], 0  ;;  %s1908_s0 = inlined_call_operand.hbm [shape: bf16[2,8,32], index: 0, kind: input, shape index: {}]   ;;  %s1909_s1 = inlined_call_operand.vmem [shape: s32[2,1,8], index: 1, kind: input, shape index: {}]   ;;  %s1910_s2 = inlined_call_operand.hbm [shape: bf16[32,96], index: 2, kind: input, shape index: {}]   ;;  %s1911_s3 = inlined_call_operand.vmem [shape: f32[1,96], index: 3, kind: input, shape index: {}]   ;;  %s1912_s4 = inlined_call_operand.hbm [shape: bf16[32,32], index: 4, kind: input, shape index: {}]   ;;  %s1913_s5 = inlined_call_operand.vmem [shape: f32[1,32], index: 5, kind: input, shape index: {}]   ;;  %s1914_s6 = inlined_call_operand.vmem [shape: f32[1,32], index: 6, kind: input, shape index: {}]   ;;  %s1915_s7 = inlined_call_operand.vmem [shape: f32[1,32], index: 7, kind: input, shape index: {}]   ;;  %s1916_s8 = inlined_call_operand.hbm [shape: bf16[2,8,32], index: 8, kind: output, shape index: {}]  }
   0x1   :  { %15 = vsyncpa [#allocation4 + $0x1], 0 }
   0x2   :  { %16 = vsyncpa [#allocation7], 0 }
   0x3   :  { %17 = vsyncpa [#allocation5], 0 }
   0x4   :  { %19 = vsyncpa [#allocation5 + $0x1], 0  ;;  %s1579_s27 = smov 0   ;;  %s1581_s28 = smov 0  }
   0x5   :  { %s1583_s29 = smov 0   ;;  %s1585_s30 = smov 0  }
   0x6 LB: > { %s1600_s9 = sadd.s32 4294967295, %s1509_s30   ;;  %s1125_s10 = sadd.s32 4294967294, %s1509_s30   ;;  %s1509_s30 = sphi %s1585_s30, %s1936_s30   ;;  %s1505_s29 = sphi %s1583_s29, %s1935_s29   ;;  %s1501_s28 = sphi %s1581_s28, %s1934_s28   ;;  %s1497_s27 = sphi %s1579_s27, %s1933_s27  }
   0x7   : > { %p45_p0 = scmp.ne.s32.totalorder %s1501_s28, %s1497_s27  ;;  %p1917_p1 = scmp.eq.s32.totalorder %s1600_s9, 0 }
   0x8   : > { %p227_p3 = scmp.eq.s32.totalorder %s1125_s10, 1  ;;  %p1126_p5 = scmp.ge.s32.totalorder %s1509_s30, 1 }
   0x9   : > { %p1609_p4 = por %p1917_p1, %p45_p0  ;;  %p234_p7 = scmp.lt.s32.totalorder %s1509_s30, 3 }
   0xa   : > { %p1614_p6 = por %p227_p3, %p45_p0  ;;  %s1511_s14 = smov [#allocation6]  }
   0xb   : > { %s1920_s11 = scalar_select %p1609_p4, 1, 0 }
   0xc   : > { %s1921_s12 = scalar_select %p1614_p6, 1, 0 }
   0xd   : > { %p1619_p8 = pnand %p1126_p5, %p234_p7  ;;  %s246_s15 = sshll.u32 %s1511_s14, 4  ;;  %s1623_s15 = int_to_ptr.vmem [resolvable:$true] %s246_s15 }
   0xe   : > { %s1512_s17 = smov [#allocation8]   ;;  %s1353_s21 = scalar_lea.hbm %s1910_s2, 256 }
   0xf   : > { %p1257_p9 = pneg %p1619_p8  ;;  %s262_s18 = sshll.u32 %s1512_s17, 4  ;;  %s1634_s18 = int_to_ptr.vmem [resolvable:$true] %s262_s18 }
  0x10   : > { %p1354_p12 = scmp.ne.s32.totalorder %s1910_s2, %s1353_s21  ;;  %p1360_p5 = scmp.lt.u32.totalorder %s1353_s21, %s1910_s2 }
  0x11   : > { %p1630_p11 = pnand %p1257_p9, %p1917_p1 }
  0x13   : > { %p1355_p13 = pneg %p1630_p11 }
  0x15   : > { %p1356_p0 = pnand %p1355_p13, %p1354_p12 }
  0x17   : > { %p1357_p3 = pneg %p1356_p0 }
  0x19   : > { %p1362_p7 = pnand %p1360_p5, %p1357_p3 }
  0x1b   : > { %1365 = shalt.err (!%p1362_p7)
}
  0x1c   : > { %s1366_s26 = scalar_lea.vmem %s1623_s15, 256  ;;  %p1374_p2 = scmp.lt.s32.totalorder %s1623_s15, %s1623_s15 }
  0x1d   : > { %p1367_p9 = scmp.ne.s32.totalorder %s1623_s15, %s1366_s26  ;;  %p1375_p12 = scmp.lt.s32.totalorder %s1366_s26, %s1366_s26 }
  0x1f   : > { %p1369_p10 = pnand %p1367_p9, %p1355_p13  ;;  %p1376_p0 = por %p1375_p12, %p1374_p2 }
  0x21   : > { %p1370_p1 = pneg %p1369_p10 }
  0x23   : > { %p1377_p6 = pnand %p1376_p0, %p1370_p1 }
  0x25   : > { %1380 = shalt.err (!%p1377_p6)
}
  0x26   : > { %s1513_s10 = smov 64   ;;  %s1514_s14 = smov 4  }
  0x27   : > { %1260 = dma.hbm_to_vmem [thread:$0]  (!%p1630_p11), %s1910_s2, 256, %s1623_s15, [#allocation7], %s1513_s10, %s1513_s10, %s1514_s14  }
  0x28   : > { %s1381_s22 = scalar_lea.hbm %s1912_s4, 256 }
  0x29   : > { %p1382_p2 = scmp.ne.s32.totalorder %s1912_s4, %s1381_s22  ;;  %p1388_p10 = scmp.lt.u32.totalorder %s1381_s22, %s1912_s4 }
  0x2b   : > { %p1384_p1 = pnand %p1382_p2, %p1355_p13 }
  0x2d   : > { %p1385_p6 = pneg %p1384_p1 }
  0x2f   : > { %p1390_p3 = pnand %p1388_p10, %p1385_p6 }
  0x31   : > { %1393 = shalt.err (!%p1390_p3)
}
  0x32   : > { %s1394_s15 = scalar_lea.vmem %s1634_s18, 256  ;;  %p1402_p12 = scmp.lt.s32.totalorder %s1634_s18, %s1634_s18 }
  0x33   : > { %p1395_p5 = scmp.ne.s32.totalorder %s1634_s18, %s1394_s15  ;;  %p1403_p0 = scmp.lt.s32.totalorder %s1394_s15, %s1394_s15 }
  0x35   : > { %p1397_p7 = pnand %p1395_p5, %p1355_p13  ;;  %p1404_p2 = por %p1403_p0, %p1402_p12 }
  0x37   : > { %p1398_p9 = pneg %p1397_p7 }
  0x39   : > { %p1405_p1 = pnand %p1404_p2, %p1398_p9 }
  0x3b   : > { %1408 = shalt.err (!%p1405_p1)
}
  0x3c   : > { %1263 = dma.hbm_to_vmem [thread:$0]  (!%p1630_p11), %s1912_s4, 256, %s1634_s18, [#allocation7], %s1513_s10, %s1513_s10, %s1514_s14  }
  0x3d   : > { %s1689_s20 = sadd.s32 1, %s1509_s30   ;;  %s32_s16 = sadd.s32 1, %s1505_s29 }
  0x3e   : > { %s29_s21 = ssub.s32 %s1509_s30, %s1689_s20  ;;  %p39_p13 = scmp.ne.s32.totalorder %s1505_s29, %s1501_s28 }
  0x3f   : > { %p30_p6 = scmp.eq.s32.totalorder %s29_s21, 0  ;;  %p40_p10 = scmp.eq.s32.totalorder %s1509_s30, 0 }
  0x40   : > { %p1924_p3 = scmp.eq.s32.totalorder %s1600_s9, 1  ;;  %p1274_p7 = scmp.lt.s32.totalorder %s1509_s30, 2 }
  0x41   : > { %s1705_s23 = scalar_select %p30_p6, %s1505_s29, %s32_s16  }
  0x42   : > { %p1699_p5 = por %p1924_p3, %p39_p13  ;;  %p41_p9 = por %p40_p10, %p39_p13 }
  0x43   : > { %s285_s24 = sand.u32 1, %s1505_s29   ;;  %s1131_s18 = sshll.u32 %s1509_s30, 6 }
  0x44   : > { %s1925_s22 = scalar_select %p1699_p5, 1, 0 }
  0x45   : > { %s1130_s25 = sshll.u32 %s285_s24, 2  ;;  %s1712_s26 = scalar_lea.hbm %s1908_s0, %s1131_s18 }
  0x46   : > { %s289_s15 = scalar_lea.vmem [#allocation3], %s1130_s25  ;;  %p1716_p11 = pnand %p1274_p7, %p41_p9 }
  0x47   : > { %s296_s17 = sshll.u32 %s289_s15, 4  ;;  %s286_s16 = scalar_lea.sflag [#allocation4], %s285_s24  ;;  %s1714_s17 = int_to_ptr.vmem [resolvable:$true] %s296_s17 }
  0x48   : > { %s1409_s21 = scalar_lea.hbm %s1712_s26, 64  ;;  %p1411_p0 = pneg %p1716_p11 }
  0x49   : > { %p1410_p12 = scmp.ne.s32.totalorder %s1712_s26, %s1409_s21  ;;  %s1414_s10 = scalar_lea.hbm %s1908_s0, 128 }
  0x4a   : > { %p1415_p13 = scmp.lt.u32.totalorder %s1712_s26, %s1908_s0  ;;  %p1416_p6 = scmp.lt.u32.totalorder %s1414_s10, %s1409_s21 }
  0x4b   : > { %p1412_p2 = pnand %p1411_p0, %p1410_p12  ;;  %p1418_p3 = scmp.lt.u32.totalorder %s1409_s21, %s1712_s26 }
  0x4c   : > { %p1417_p10 = por %p1416_p6, %p1415_p13 }
  0x4d   : > { %p1413_p1 = pneg %p1412_p2 }
  0x4e   : > { %p1419_p7 = por %p1418_p3, %p1417_p10 }
  0x50   : > { %p1420_p9 = pnand %p1419_p7, %p1413_p1 }
  0x52   : > { %1423 = shalt.err (!%p1420_p9)
}
  0x53   : > { %s1424_s24 = scalar_lea.vmem %s1714_s17, 64  ;;  %s1515_s18 = smov [#allocation3]  }
  0x54   : > { %p1425_p12 = scmp.ne.s32.totalorder %s1714_s17, %s1424_s24  ;;  %s1429_s25 = sshll.u32 %s1515_s18, 4  ;;  %s1430_s25 = int_to_ptr.vmem [resolvable:$false] %s1429_s25 }
  0x55   : > { %s1431_s14 = scalar_lea.vmem %s1430_s25, 128  ;;  %p1432_p4 = scmp.lt.s32.totalorder %s1714_s17, %s1430_s25 }
  0x56   : > { %p1427_p2 = pnand %p1425_p12, %p1411_p0  ;;  %p1433_p13 = scmp.lt.s32.totalorder %s1431_s14, %s1424_s24 }
  0x58   : > { %p1428_p5 = pneg %p1427_p2  ;;  %p1434_p6 = por %p1433_p13, %p1432_p4 }
  0x5a   : > { %p1435_p10 = pnand %p1434_p6, %p1428_p5 }
  0x5c   : > { %1438 = shalt.err (!%p1435_p10)
}
  0x5d   : > { %1267 = dma.hbm_to_vmem [thread:$0]  (!%p1716_p11), %s1712_s26, 64, %s1714_s17, %s286_s16  }
  0x5e   : > { %311 = sbr.rel (%p1619_p8) target bundleno = 1782 (0x6f6), region = 52  ;;  %s1748_s21 = sand.u32 (!%p1619_p8), 1, %s1501_s28  }
  0x5f   : > { %s1133_s10 = sshll.u32 (!%p1619_p8), %s1748_s21, 2  ;;  %s314_s15 = scalar_lea.sflag (!%p1619_p8), [#allocation4], %s1748_s21 }
  0x60   : > { %s317_s24 = scalar_lea.vmem (!%p1619_p8), [#allocation3], %s1133_s10  ;;  %p1927_p4 = scmp.ne.s32.totalorder (!%p1619_p8), %s1920_s11, 0 }
  0x65   : > { %1484 = dma.done.wait (%p1927_p4), %s314_s15, 64  }
  0x66   : > { %1486 = vsyncadd (%p1927_p4), %s314_s15, 4294967232  ;;  %p1928_p5 = scmp.eq.s32.totalorder %s1600_s9, 0 }
  0x68   : > { %1488 = dma.done.wait (%p1928_p5), [#allocation7], 512   ;;  %p1929_p8 = pmov %p1928_p5 }
  0x69   : > { %v1516_v0 = vmov 0.0   ;;  %vm1517_vm0 = vmmov 0   ;;  %v1331_v1 = vld [vmem:[#allocation6] sm:$0xff]   ;;  %v1332_v2 = vld [vmem:[#allocation6 + $0x8] sm:$0xff]   ;;  %v1769_v3 = vld [vmem:[%s317_s24] sm:$0xf]  ;;  %v489_v24 = vlaneseq }
  0x6a   : > { %1490 = vsyncadd (%p1929_p8), [#allocation7], 4294966784  ;;  %1181 = vmatprep.subr.bf16.mxu0 %v1516_v0  ;;  %1185 = vmatprep.mubr.msk.bf16.mxu0 %vm1517_vm0, %v1516_v0  ;;  %vm389_vm1 = vcmask 261120   ;;  %v1137_v4 = vld [vmem:[%s1911_s3] ss:$0 sm:$0xff]  ;;  %s1518_s26 = smov 96  }
  0x6b   : > { %1189 = vmatprep.subr.bf16.mxu1 %v1516_v0  ;;  %1191 = vmatprep.mubr.msk.bf16.mxu1 %vm1517_vm0, %v1516_v0  ;;  %s1519_s17 = smov 120   ;;  %s1520_s19 = smov 88   ;;  %vm440_vm2 = vcmask 64512   ;;  %v490_v26 = vshrl.u32 %v489_v24, 7  ;;  %v1525_v28 = vmov 0   ;;  %vm512_vm5 = vcmask 1043456  }
  0x6c   : > { %1182 = vmatpush3.bf16.msra.mxu0 %v1331_v1  ;;  %s1521_s16 = smov 80   ;;  %s1522_s18 = smov 112   ;;  %vm673_vm6 = vcmask 130112   ;;  %vm790_vm7 = vcmask 195712   ;;  %vm907_vm8 = vcmask 261312   ;;  %vm1011_vm9 = vcmask 257024  }
  0x6d   : > { %1183 = vmatprep.subr.bf16.mxu0 %v1516_v0  ;;  %s1523_s25 = smov 72   ;;  %s1524_s14 = smov 104   ;;  %v491_v27 = vsub.s32 0, %v490_v26 }
  0x6e   : > { %p361_p11 = scmp.lt.s32.totalorder %s1600_s9, 1  ;;  %s1014_s24 = scalar_lea.sflag [#allocation5], %s1748_s21 }
  0x6f   : > { %p1930_p1 = scmp.ne.s32.totalorder %s1925_s22, 0 }
  0x70   : > { %1184 = vmatpush3.bf16.msra.mxu0 %v1332_v2  ;;  %s362_s15 = scalar_select %p361_p11, %s1600_s9, 1 }
  0x71   : > { %1195 = vmatprep.subr.bf16.mxu0 %v1516_v0 }
  0x72   : > { %s363_s13 = scalar_lea.vmem %s1909_s1, %s362_s15 }
  0x73   : > { %1186 = vmatmul.mubr.msk.bf16.vlgmr.msra.gmra.mrb[0].mxu0 %vm389_vm1, %v1769_v3  ;;  %v433_v25 = vld [vmem:[%s363_s13] sm:$0x1] }
  0x74   : > { %1197 = vmatprep.mubr.msk.bf16.mxu0 %vm1517_vm0, %v1516_v0  ;;  %vm487_vm3 = vcmp.eq.s32.totalorder %v433_v25, 0 }
  0x75   : > { %v488_v29 = vsel %vm487_vm3, 1, %v1525_v28 }
  0x76   : > { %v492_v30 = vrot.slane %v488_v29, %v491_v27 }
  0x78   : > { %vm493_vm4 = vcmp.eq.s32.totalorder %v492_v30, 1 }
 0x146   : > { %v427_v5 = vpop.f32.mrb[0].mxu0 }
 0x147   : > { %v428_v6 = vadd.f32 %v1137_v4, %v427_v5  ;;  %v1187_v7 = vpop.f32.mrb[1].mxu0 }
 0x148   : > { %v430_v8 = vpop.f32.mrb[2].mxu0 }
 0x149   : > { %v434_v9 = vmul.f32 0.35355338, %v428_v6  ;;  %v1779_v10 = vpack.c.bf16 %v428_v6, %v428_v6  ;;  %v1188_v11 = vpop.f32.mrb[3].mxu0 }
 0x14b   : > { %v435_v12 = vpack.c.bf16 %v434_v9, %v434_v9  ;;  %438 = vrot.lane.b32.xlu0 %v1779_v10, %s1518_s26  ;;  %s1526_s26 = smov 56  }
 0x14d   : > { %558 = vrot.lane.b32.xlu1 %v435_v12, %s1519_s17  ;;  %s1527_s17 = smov 64  }
 0x14f   : > { %560 = vrot.lane.b32.xlu0 %v1779_v10, %s1520_s19  ;;  %s1528_s19 = smov 40  }
 0x151   : > { %677 = vrot.lane.b32.xlu1 %v1779_v10, %s1521_s16  ;;  %s1529_s16 = smov 48  }
 0x153   : > { %675 = vrot.lane.b32.xlu0 %v435_v12, %s1522_s18  ;;  %s1530_s18 = smov 8  }
 0x155   : > { %794 = vrot.lane.b32.xlu1 %v1779_v10, %s1523_s25  ;;  %s1531_s25 = smov 16  }
 0x157   : > { %792 = vrot.lane.b32.xlu0 %v435_v12, %s1524_s14  ;;  %s1532_s14 = smov 24  }
 0x1bd   : > { %v439_v13 = vpop.permute.xlu0 %438 }
 0x1be   : > { %v445_v14 = vsel %vm440_vm2, %v439_v13, 0 }
 0x1bf   : > { %1190 = vmatpush3.bf16.xpose.msra.mxu1 %v445_v14  ;;  %v559_v16 = vpop.permute.xlu1 %558 }
 0x1c0   : > { %1201 = vmatprep.subr.bf16.mxu1 %v1516_v0 }
 0x1c1   : > { %v561_v15 = vpop.permute.xlu0 %560 }
 0x1c2   : > { %v566_v17 = vsel %vm440_vm2, %v561_v15, 0 }
 0x1c3   : > { %v678_v18 = vpop.permute.xlu1 %677 }
 0x1c4   : > { %v683_v19 = vsel %vm440_vm2, %v678_v18, 0 }
 0x1c5   : > { %v676_v21 = vpop.permute.xlu0 %675 }
 0x1c6   : > { %1192 = vmatmul.mubr.msk.bf16.vlgmr.msra.gmra.mrb[0].mxu1 %vm440_vm2, %v435_v12 }
 0x1c7   : > { %1202 = vmatpush3.bf16.xpose.msra.mxu1 %v566_v17  ;;  %1203 = vmatprep.mubr.msk.bf16.mxu1 %vm1517_vm0, %v1516_v0  ;;  %v795_v20 = vpop.permute.xlu1 %794 }
 0x1c8   : > { %1213 = vmatprep.subr.bf16.mxu1 %v1516_v0  ;;  %v800_v22 = vsel %vm440_vm2, %v795_v20, 0 }
 0x1c9   : > { %v793_v23 = vpop.permute.xlu0 %792 }
 0x1ce   : > { %1204 = vmatmul.mubr.msk.bf16.vlgmr.msra.gmra.mrb[4].mxu1 %vm440_vm2, %v559_v16 }
 0x1cf   : > { %1214 = vmatpush3.bf16.xpose.msra.mxu1 %v683_v19  ;;  %1215 = vmatprep.mubr.msk.bf16.mxu1 %vm1517_vm0, %v1516_v0 }
 0x1d0   : > { %1225 = vmatprep.subr.bf16.mxu1 %v1516_v0 }
 0x1d6   : > { %1216 = vmatmul.mubr.msk.bf16.vlgmr.msra.gmra.mrb[8].mxu1 %vm440_vm2, %v676_v21 }
 0x1d7   : > { %1226 = vmatpush3.bf16.xpose.msra.mxu1 %v800_v22  ;;  %1227 = vmatprep.mubr.msk.bf16.mxu1 %vm1517_vm0, %v1516_v0 }
 0x1d8   : > { %1237 = vmatprep.subr.bf16.mxu1 %v1516_v0 }
 0x1de   : > { %1228 = vmatmul.mubr.msk.bf16.vlgmr.msra.gmra.mrb[12].mxu1 %vm440_vm2, %v793_v23 }
 0x1df   : > { %1241 = vmatprep.mubr.msk.bf16.mxu1 %vm1517_vm0, %v1516_v0 }
 0x299   : > { %v481_v31 = vpop.f32.mrb[0].mxu1 }
 0x29a   : > { %v494_v32 = vsel %vm493_vm4, -1e+10, %v481_v31  ;;  %v1193_v33 = vpop.f32.mrb[1].mxu1 }
 0x29b   : > { %v484_v34 = vpop.f32.mrb[2].mxu1  ;;  %v495_v35 = vsel %vm440_vm2, %v494_v32, -inf }
 0x29c   : > { %496 = vmax.xlane.f32.xlu1 %v495_v35  ;;  %v1194_v36 = vpop.f32.mrb[3].mxu1 }
 0x2a1   : > { %v602_v37 = vpop.f32.mrb[4].mxu1 }
 0x2a2   : > { %v608_v38 = vsel %vm493_vm4, -1e+10, %v602_v37  ;;  %v1205_v39 = vpop.f32.mrb[5].mxu1 }
 0x2a3   : > { %v605_v40 = vpop.f32.mrb[6].mxu1  ;;  %v609_v41 = vsel %vm440_vm2, %v608_v38, -inf }
 0x2a4   : > { %610 = vmax.xlane.f32.xlu0 %v609_v41  ;;  %v1206_v42 = vpop.f32.mrb[7].mxu1 }
 0x2a9   : > { %v719_v43 = vpop.f32.mrb[8].mxu1 }
 0x2aa   : > { %v725_v44 = vsel %vm493_vm4, -1e+10, %v719_v43  ;;  %v1217_v45 = vpop.f32.mrb[9].mxu1 }
 0x2ab   : > { %v722_v46 = vpop.f32.mrb[10].mxu1  ;;  %v726_v47 = vsel %vm440_vm2, %v725_v44, -inf  ;;  %v1333_v45 = vld [vmem:[#allocation8] sm:$0xff]  }
 0x2ac   : > { %727 = vmax.xlane.f32.xlu0 %v726_v47  ;;  %v1218_v48 = vpop.f32.mrb[11].mxu1  ;;  %1238 = vmatpush3.bf16.msra.mxu1 %v1333_v45  ;;  %v1334_v46 = vld [vmem:[#allocation8 + $0x8] sm:$0xff]  }
 0x2ad   : > { %1239 = vmatprep.subr.bf16.mxu1 %v1516_v0 }
 0x2b0   : > { %1240 = vmatpush3.bf16.msra.mxu1 %v1334_v46 }
 0x2b1   : > { %v836_v49 = vpop.f32.mrb[12].mxu1 }
 0x2b2   : > { %v842_v50 = vsel %vm493_vm4, -1e+10, %v836_v49  ;;  %v1229_v51 = vpop.f32.mrb[13].mxu1 }
 0x2b3   : > { %v839_v52 = vpop.f32.mrb[14].mxu1  ;;  %v843_v53 = vsel %vm440_vm2, %v842_v50, -inf }
 0x2b4   : > { %844 = vmax.xlane.f32.xlu1 %v843_v53  ;;  %v1230_v54 = vpop.f32.mrb[15].mxu1 }
 0x329   : > { %v497_v55 = vpop.xlane.xlu1 %496 }
 0x32a   : > { %v498_v56 = vsub.f32 %v494_v32, %v497_v55 }
 0x32c   : > { %v499_v57 = vmul.f32 1.442695, %v498_v56 }
 0x32e   : > { %1335 = vpow2.f32 %v499_v57 }
 0x331   : > { %v611_v58 = vpop.xlane.xlu0 %610 }
 0x332   : > { %v612_v59 = vsub.f32 %v608_v38, %v611_v58 }
 0x334   : > { %v613_v60 = vmul.f32 1.442695, %v612_v59  ;;  %v1149_v59 = vld [vmem:[%s1913_s5] ss:$0 sm:$0xff] }
 0x336   : > { %1337 = vpow2.f32 %v613_v60  ;;  %v977_v60 = vunpack.c.l.bf16 %v1769_v3 }
 0x338   : > { %v1336_v61 = vpop.eup %1335 }
 0x339   : > { %v728_v62 = vpop.xlane.xlu0 %727  ;;  %v501_v63 = vsel %vm440_vm2, %v1336_v61, 0.0 }
 0x33a   : > { %v729_v1 = vsub.f32 %v725_v44, %v728_v62  ;;  %502 = vadd.xlane.f32.xlu0 %v501_v63 }
 0x33c   : > { %v730_v2 = vmul.f32 1.442695, %v729_v1 }
 0x33e   : > { %1339 = vpow2.f32 %v730_v2 }
 0x340   : > { %v1338_v4 = vpop.eup %1337 }
 0x341   : > { %v615_v5 = vsel %vm440_vm2, %v1338_v4, 0.0  ;;  %v845_v8 = vpop.xlane.xlu1 %844 }
 0x342   : > { %616 = vadd.xlane.f32.xlu1 %v615_v5  ;;  %v846_v9 = vsub.f32 %v842_v50, %v845_v8 }
 0x344   : > { %v847_v11 = vmul.f32 1.442695, %v846_v9 }
 0x346   : > { %1341 = vpow2.f32 %v847_v11 }
 0x348   : > { %v1340_v6 = vpop.eup %1339 }
 0x349   : > { %v732_v7 = vsel %vm440_vm2, %v1340_v6, 0.0 }
 0x34a   : > { %733 = vadd.xlane.f32.xlu0 %v732_v7 }
 0x350   : > { %v1342_v12 = vpop.eup %1341 }
 0x351   : > { %v849_v13 = vsel %vm440_vm2, %v1342_v12, 0.0 }
 0x353   : > { %621 = vrot.lane.b32.xlu1 %v1779_v10, %s1526_s26 }
 0x360   : > { %507 = vrot.lane.b32.xlu0 %v1779_v10, %s1527_s17 }
 0x364   : > { %855 = vrot.lane.b32.xlu0 %v1779_v10, %s1528_s19  ;;  %s1156_s19 = sshll.u32 %s1600_s9, 6  ;;  %s1533_s9 = smov [#allocation9]  }
 0x365   : > { %s1864_s15 = scalar_lea.hbm %s1916_s8, %s1156_s19 }
 0x377   : > { %850 = vadd.xlane.f32.xlu1 %v849_v13 }
 0x388   : > { %738 = vrot.lane.b32.xlu1 %v1779_v10, %s1529_s16  ;;  %s360_s16 = scalar_lea.vmem [#allocation9], %s1133_s10  ;;  %s1443_s10 = sshll.u32 %s1533_s9, 4  ;;  %s1444_s10 = int_to_ptr.vmem [resolvable:$false] %s1443_s10 }
 0x389   : > { %s1445_s13 = scalar_lea.vmem %s1444_s10, 128 }
 0x3c7   : > { %v503_v14 = vpop.xlane.xlu0 %502 }
 0x3c8   : > { %1343 = vrcp.f32 %v503_v14 }
 0x3cf   : > { %v617_v15 = vpop.xlane.xlu1 %616 }
 0x3d0   : > { %1345 = vrcp.f32 %v617_v15 }
 0x3d2   : > { %v1344_v16 = vpop.eup %1343 }
 0x3d3   : > { %v505_v18 = vmul.f32 %v1344_v16, %v1336_v61  ;;  %v622_v21 = vpop.permute.xlu1 %621 }
 0x3d4   : > { %v627_v24 = vsel %vm512_vm5, %v622_v21, 0 }
 0x3d5   : > { %v506_v22 = vpack.c.bf16 %v505_v18, %v505_v18 }
 0x3d7   : > { %v734_v17 = vpop.xlane.xlu0 %733 }
 0x3d8   : > { %1347 = vrcp.f32 %v734_v17  ;;  %v1153_v17 = vld [vmem:[%s1914_s6] ss:$0 sm:$0xff] }
 0x3da   : > { %v1346_v23 = vpop.eup %1345 }
 0x3db   : > { %v508_v19 = vpop.permute.xlu0 %507  ;;  %v619_v10 = vmul.f32 %v1346_v23, %v1338_v4 }
 0x3dc   : > { %v514_v20 = vsel %vm512_vm5, %v508_v19, 0  ;;  %v1154_v19 = vld [vmem:[%s1915_s7] ss:$0 sm:$0xff] }
 0x3dd   : > { %1196 = vmatpush3.bf16.msra.mxu0 %v514_v20  ;;  %v620_v25 = vpack.c.bf16 %v619_v10, %v619_v10 }
 0x3de   : > { %1207 = vmatprep.subr.bf16.mxu0 %v1516_v0 }
 0x3df   : > { %v856_v31 = vpop.permute.xlu0 %855 }
 0x3e0   : > { %1198 = vmatmul.mubr.msk.bf16.vlgmr.msra.gmra.mrb[4].mxu0 %vm440_vm2, %v506_v22  ;;  %v861_v33 = vsel %vm512_vm5, %v856_v31, 0 }
 0x3e1   : > { %1208 = vmatpush3.bf16.msra.mxu0 %v627_v24  ;;  %1209 = vmatprep.mubr.msk.bf16.mxu0 %vm1517_vm0, %v1516_v0 }
 0x3e2   : > { %1219 = vmatprep.subr.bf16.mxu0 %v1516_v0  ;;  %v1348_v26 = vpop.eup %1347 }
 0x3e3   : > { %v736_v28 = vmul.f32 %v1348_v26, %v1340_v6 }
 0x3e5   : > { %v737_v32 = vpack.c.bf16 %v736_v28, %v736_v28 }
 0x3e8   : > { %1210 = vmatmul.mubr.msk.bf16.vlgmr.msra.gmra.mrb[8].mxu0 %vm440_vm2, %v620_v25 }
 0x3e9   : > { %1221 = vmatprep.mubr.msk.bf16.mxu0 %vm1517_vm0, %v1516_v0 }
 0x404   : > { %v851_v27 = vpop.xlane.xlu1 %850 }
 0x405   : > { %1349 = vrcp.f32 %v851_v27 }
 0x408   : > { %v739_v29 = vpop.permute.xlu1 %738 }
 0x409   : > { %v744_v30 = vsel %vm512_vm5, %v739_v29, 0 }
 0x40a   : > { %1220 = vmatpush3.bf16.msra.mxu0 %v744_v30 }
 0x40b   : > { %1231 = vmatprep.subr.bf16.mxu0 %v1516_v0 }
 0x40d   : > { %1222 = vmatmul.mubr.msk.bf16.vlgmr.msra.gmra.mrb[12].mxu0 %vm440_vm2, %v737_v32 }
 0x40e   : > { %1232 = vmatpush3.bf16.msra.mxu0 %v861_v33  ;;  %1233 = vmatprep.mubr.msk.bf16.mxu0 %vm1517_vm0, %v1516_v0 }
 0x40f   : > { %v1350_v34 = vpop.eup %1349 }
 0x410   : > { %v853_v35 = vmul.f32 %v1350_v34, %v1342_v12 }
 0x412   : > { %v854_v36 = vpack.c.bf16 %v853_v35, %v853_v35 }
 0x415   : > { %1234 = vmatmul.mubr.msk.bf16.vlgmr.msra.gmra.mrb[16].mxu0 %vm440_vm2, %v854_v36 }
 0x4b3   : > { %v550_v37 = vpop.f32.mrb[4].mxu0 }
 0x4b4   : > { %556 = vst.msk [vmem:[#allocation2] sm:$0xff] %vm440_vm2, %v550_v37  ;;  %v1199_v38 = vpop.f32.mrb[5].mxu0 }
 0x4b5   : > { %v553_v39 = vpop.f32.mrb[6].mxu0 }
 0x4b6   : > { %v1200_v40 = vpop.f32.mrb[7].mxu0 }
 0x4bb   : > { %v663_v41 = vpop.f32.mrb[8].mxu0 }
 0x4bc   : > { %670 = vrot.lane.b32.xlu1 %v663_v41, %s1530_s18  ;;  %v1211_v42 = vpop.f32.mrb[9].mxu0  ;;  %s1027_s18 = sshll.u32 %s360_s16, 4  ;;  %s1866_s18 = int_to_ptr.vmem [resolvable:$true] %s1027_s18 }
 0x4bd   : > { %v666_v43 = vpop.f32.mrb[10].mxu0  ;;  %s1439_s11 = scalar_lea.vmem %s1866_s18, 64  ;;  %p1446_p9 = scmp.lt.s32.totalorder %s1866_s18, %s1444_s10 }
 0x4be   : > { %v1212_v44 = vpop.f32.mrb[11].mxu0  ;;  %p1440_p0 = scmp.ne.s32.totalorder %s1866_s18, %s1439_s11  ;;  %p1447_p12 = scmp.lt.s32.totalorder %s1445_s13, %s1439_s11 }
 0x4c0   : > { %p1441_p3 = pnand %p1440_p0, %p1930_p1  ;;  %p1448_p2 = por %p1447_p12, %p1446_p9 }
 0x4c2   : > { %p1442_p7 = pneg %p1441_p3 }
 0x4c4   : > { %p1449_p13 = pnand %p1448_p2, %p1442_p7 }
 0x4e0   : > { %v780_v47 = vpop.f32.mrb[12].mxu0 }
 0x4e1   : > { %787 = vrot.lane.b32.xlu0 %v780_v47, %s1531_s25  ;;  %v1223_v48 = vpop.f32.mrb[13].mxu0 }
 0x4e2   : > { %v783_v49 = vpop.f32.mrb[14].mxu0 }
 0x4e3   : > { %v1224_v50 = vpop.f32.mrb[15].mxu0 }
 0x4e8   : > { %v897_v51 = vpop.f32.mrb[16].mxu0 }
 0x4e9   : > { %904 = vrot.lane.b32.xlu1 %v897_v51, %s1532_s14  ;;  %v1235_v52 = vpop.f32.mrb[17].mxu0 }
 0x4ea   : > { %v900_v53 = vpop.f32.mrb[18].mxu0 }
 0x4eb   : > { %v1236_v54 = vpop.f32.mrb[19].mxu0 }
 0x52e   : > { %v671_v55 = vpop.permute.xlu1 %670 }
 0x52f   : > { %674 = vst.msk [vmem:[#allocation2] sm:$0xff] %vm673_vm6, %v671_v55 }
 0x553   : > { %v788_v56 = vpop.permute.xlu0 %787 }
 0x554   : > { %791 = vst.msk [vmem:[#allocation2] sm:$0xff] %vm790_vm7, %v788_v56 }
 0x55b   : > { %v905_v0 = vpop.permute.xlu1 %904 }
 0x55c   : > { %908 = vst.msk [vmem:[#allocation2] sm:$0xff] %vm907_vm8, %v905_v0 }
 0x563   : > { %v909_v57 = vld [vmem:[#allocation2] sm:$0xff] }
 0x564   : > { %v910_v58 = vpack.c.bf16 %v909_v57, %v909_v57 }
 0x566   : > { %1242 = vmatmul.mubr.msk.bf16.vlgmr.msra.gmra.mrb[16].mxu1 %vm389_vm1, %v910_v58 }
 0x639   : > { %v971_v61 = vpop.f32.mrb[16].mxu1 }
 0x63a   : > { %v972_v62 = vadd.f32 %v1149_v59, %v971_v61  ;;  %v1243_v63 = vpop.f32.mrb[17].mxu1 }
 0x63b   : > { %v974_v1 = vpop.f32.mrb[18].mxu1 }
 0x63c   : > { %v978_v2 = vadd.f32 %v977_v60, %v972_v62  ;;  %v1244_v4 = vpop.f32.mrb[19].mxu1 }
 0x63e   : > { %v981_v5 = vsel %vm389_vm1, %v978_v2, 0.0  ;;  %v985_v6 = vmul.f32 %v978_v2, %v978_v2 }
 0x63f   : > { %982 = vadd.xlane.f32.xlu0 %v981_v5 }
 0x640   : > { %v986_v7 = vsel %vm389_vm1, %v985_v6, 0.0 }
 0x641   : > { %987 = vadd.xlane.f32.xlu1 %v986_v7 }
 0x6cc   : > { %v983_v8 = vpop.xlane.xlu0 %982 }
 0x6cd   : > { %v984_v9 = vmul.f32 0.03125, %v983_v8 }
 0x6ce   : > { %v988_v11 = vpop.xlane.xlu1 %987 }
 0x6cf   : > { %v990_v12 = vmul.f32 %v984_v9, %v984_v9  ;;  %v989_v3 = vmul.f32 0.03125, %v988_v11  ;;  %v992_v15 = vsub.f32 %v978_v2, %v984_v9 }
 0x6d1   : > { %v991_v13 = vsub.f32 %v989_v3, %v990_v12 }
 0x6d3   : > { %v993_v14 = vadd.f32 1e-05, %v991_v13 }
 0x6d5   : > { %1351 = vrsqrt.f32 %v993_v14 }
 0x6df   : > { %v1352_v16 = vpop.eup %1351 }
 0x6e0   : > { %v995_v18 = vmul.f32 %v1352_v16, %v992_v15 }
 0x6e2   : > { %v1002_v20 = vmul.f32 %v1153_v17, %v995_v18 }
 0x6e4   : > { %v1009_v21 = vadd.f32 %v1154_v19, %v1002_v20 }
 0x6e6   : > { %v1010_v22 = vpack.c.bf16 %v1009_v21, %v1009_v21 }
 0x6e8   : > { %1012 = vst.msk [vmem:[%s360_s16] sm:$0xf] %vm1011_vm9, %v1010_v22 }
 0x6e9   : > { %1452 = shalt.err (!%p1449_p13)
}
 0x6ea   : > { %s1453_s21 = scalar_lea.hbm %s1864_s15, 64  ;;  %s1457_s19 = scalar_lea.hbm %s1916_s8, 128 }
 0x6eb   : > { %p1454_p6 = scmp.ne.s32.totalorder %s1864_s15, %s1453_s21  ;;  %p1458_p5 = scmp.lt.u32.totalorder %s1864_s15, %s1916_s8 }
 0x6ec   : > { %p1459_p8 = scmp.lt.u32.totalorder %s1457_s19, %s1453_s21  ;;  %p1461_p0 = scmp.lt.u32.totalorder %s1453_s21, %s1864_s15 }
 0x6ed   : > { %p1455_p10 = pnand %p1454_p6, %p1930_p1 }
 0x6ee   : > { %p1460_p11 = por %p1459_p8, %p1458_p5 }
 0x6ef   : > { %p1456_p4 = pneg %p1455_p10 }
 0x6f0   : > { %p1462_p3 = por %p1461_p0, %p1460_p11 }
 0x6f2   : > { %p1463_p7 = pnand %p1462_p3, %p1456_p4 }
 0x6f4   : > { %1466 = shalt.err (!%p1463_p7)
}
 0x6f5   : > { %1255 = dma.vmem_to_hbm [thread:$0]  (%p1930_p1), %s1866_s18, 64, %s1864_s15, %s1014_s24  }
 0x6f6 PF: > { %s1039_s14 = sand.u32 1, %s1497_s27   ;;  %p1931_p9 = scmp.ne.s32.totalorder %s1921_s12, 0 }
 0x6f7   : > { %p1932_p12 = scmp.ge.s32.totalorder %s1509_s30, 2  ;;  %s1040_s11 = scalar_lea.sflag [#allocation5], %s1039_s14 }
 0x6f9   : > { %p1269_p2 = pnand %p1932_p12, %p1931_p9 }
 0x6fb   : > { %1492 = dma.done.wait (!%p1269_p2), %s1040_s11, 64  }
 0x6fc   : > { %1494 = vsyncadd (!%p1269_p2), %s1040_s11, 4294967232  ;;  %p22_p13 = scmp.ge.s32.totalorder %s1689_s20, 4   ;;  %s1933_s27 = smov %s1501_s28 }
 0x6fd   : > { %s1934_s28 = smov %s1505_s29  ;;  %s1935_s29 = smov %s1705_s23 }
 0x6fe   : > { %s1936_s30 = smov %s1689_s20  ;;  %24 = sbr.rel (!%p22_p13) target bundleno = 6 (0x6), region = 108 }
 0x705   :  { %1045 = vsyncpa [#allocation4], 1 }
 0x706   :  { %1047 = vsyncpa [#allocation4 + $0x1], 1 }
 0x707   :  { %1048 = vsyncpa [#allocation7], 1 }
 0x708   :  { %1049 = vsyncpa [#allocation5], 1 }
 0x709   :  { %1051 = vsyncpa [#allocation5 + $0x1], 1 }

</bundles_post_ra>
